<compile_context>
chip_gen: v6e
topology: v6e:2x2x1
jax: 0.10.0
libtpu: 0.0.40
codegen_flags: <defaults>
</compile_context>

<pallas_src>
import functools

import jax
import jax.numpy as jnp
import numpy as np
from jax import lax
from jax.experimental import pallas as pl
from jax.experimental.pallas import tpu as pltpu

EPS = 1e-5


def _conv3x3_flat(a, masks, w_ref, H, W):
    """3x3 'same' conv in channel-major / flat-pixel (lane-dense) layout.

    a:     (C, H*W)  f32 activations, pixels on lanes (H*W multiple of 128).
    masks: (9, H*W)  f32 per-tap validity masks (implements the zero padding).
    w_ref: (Cout, 9*C) bf16 VMEM ref, tap-major (ky, kx) then ci.
    Returns the (Cout, H*W) f32 result of ONE im2col MXU matmul with K = 9*C.
    """
    C, HW = a.shape
    P = W + 1                                        # covers the largest tap offset
    z = jnp.zeros((C, P), a.dtype)
    ap = jnp.concatenate([z, a, z], axis=1)          # (C, HW + 2P), zero-extended pixels

    taps = []
    for k in range(9):
        ky, kx = k // 3, k % 3
        s = (ky - 1) * W + (kx - 1)                  # flat offset of this tap's source
        v = ap[:, P + s:P + s + HW]                  # v[:, p] = a[:, p+s] (zero OOB rows)
        taps.append(v * masks[k:k + 1, :])           # mask kills column-edge spill
    slab = jnp.concatenate(taps, axis=0)             # (9*C, H*W) im2col slab

    return jnp.dot(w_ref[...], slab.astype(jnp.bfloat16),
                   preferred_element_type=jnp.float32)


def _conv_stats_kernel(x_ref, w_ref, m_ref, y_ref, sum_ref, ssq_ref, *, H, W):
    """conv1 (bias dropped: cancelled by train-mode BN) + per-step channel sum / sumsq."""
    acc = _conv3x3_flat(x_ref[0], m_ref[...], w_ref, H, W)       # (Cout, H*W) f32
    y_ref[0] = acc.astype(y_ref.dtype)
    sum_ref[0] = jnp.sum(acc, axis=1, keepdims=True)             # (Cout, 1)
    ssq_ref[0] = jnp.sum(acc * acc, axis=1, keepdims=True)


def _bn_conv_stats_kernel(y_ref, sc_ref, sh_ref, w_ref, m_ref,
                          o_ref, sum_ref, ssq_ref, *, H, W):
    """BN1 (folded scale/shift) + ReLU in f32, then conv2 + per-step channel stats."""
    a = jnp.maximum(y_ref[0].astype(jnp.float32) * sc_ref[...] + sh_ref[...], 0.0)
    acc = _conv3x3_flat(a, m_ref[...], w_ref, H, W)              # (Cout, H*W) f32
    o_ref[0] = acc.astype(o_ref.dtype)
    sum_ref[0] = jnp.sum(acc, axis=1, keepdims=True)
    ssq_ref[0] = jnp.sum(acc * acc, axis=1, keepdims=True)


def _bn_relu_kernel(y_ref, sc_ref, sh_ref, o_ref):
    """BN2 (folded scale/shift) + ReLU, purely elementwise, lane-dense stores."""
    o_ref[0] = jnp.maximum(
        y_ref[0].astype(jnp.float32) * sc_ref[...] + sh_ref[...], 0.0)


def _fold_bn(psum, pssq, gamma, beta, count):
    """Fold train-mode BN (biased batch variance) into per-channel (scale, shift)."""
    mean = jnp.sum(psum, axis=0)[:, 0] / count                   # (Cout,)
    var = jnp.sum(pssq, axis=0)[:, 0] / count - mean * mean
    scale = gamma * lax.rsqrt(var + EPS)
    shift = beta - mean * scale
    return scale[:, None], shift[:, None]                        # (Cout, 1): lane-broadcast


def _border_masks(H, W):
    """(9, H*W) f32 tap-validity masks over flattened pixels (compile-time constant)."""
    p = np.arange(H * W)
    hh, ww = p // W, p % W
    rows = []
    for ky in range(3):
        for kx in range(3):
            rows.append((hh + ky - 1 >= 0) & (hh + ky - 1 < H) &
                        (ww + kx - 1 >= 0) & (ww + kx - 1 < W))
    return jnp.asarray(np.stack(rows).astype(np.float32))


@jax.jit
def double_conv(x_nchw, params):
    """x_nchw: (N, Cin, H, W) f32.  Returns (N, Cout, H, W) f32 (PyTorch training forward)."""
    w1, b1, g1, be1, w2, b2, g2, be2 = params
    del b1, b2  # exactly cancelled by the train-mode BatchNorm mean subtraction
    N, Cin, H, W = x_nchw.shape
    Cout = w1.shape[0]
    HW = H * W
    count = float(N * HW)

    # NCHW -> (N, C, H*W) is a pure reshape of contiguous memory: no HBM transpose pass.
    x = x_nchw.reshape(N, Cin, HW).astype(jnp.float32)
    # PyTorch (Cout, Cin, 3, 3) -> (Cout, 9*Cin) bf16, tap-major (ky, kx) then ci.
    w1_2d = jnp.transpose(w1, (0, 2, 3, 1)).reshape(Cout, 9 * Cin).astype(jnp.bfloat16)
    w2_2d = jnp.transpose(w2, (0, 2, 3, 1)).reshape(Cout, 9 * Cout).astype(jnp.bfloat16)
    masks = _border_masks(H, W)                                  # (9, HW) f32

    par = pltpu.CompilerParams(dimension_semantics=("parallel",))
    blk_x = pl.BlockSpec((1, Cin, HW), lambda n: (n, 0, 0))
    blk_y = pl.BlockSpec((1, Cout, HW), lambda n: (n, 0, 0))
    blk_w1 = pl.BlockSpec((Cout, 9 * Cin), lambda n: (0, 0))
    blk_w2 = pl.BlockSpec((Cout, 9 * Cout), lambda n: (0, 0))
    blk_m = pl.BlockSpec((9, HW), lambda n: (0, 0))
    blk_v = pl.BlockSpec((Cout, 1), lambda n: (0, 0))
    blk_s = pl.BlockSpec((1, Cout, 1), lambda n: (n, 0, 0))
    stat_shape = jax.ShapeDtypeStruct((N, Cout, 1), jnp.float32)

    def conv_cost(cin):
        return pl.CostEstimate(
            flops=2 * N * HW * 9 * cin * Cout, transcendentals=0,
            bytes_accessed=N * HW * (4 * cin + 2 * Cout) + 2 * 9 * cin * Cout)

    # ---- pass 1: conv1 + per-step batch partial stats (batch axis fully parallel) ----
    y1, s1, q1 = pl.pallas_call(
        functools.partial(_conv_stats_kernel, H=H, W=W),
        grid=(N,),
        in_specs=[blk_x, blk_w1, blk_m],
        out_specs=[blk_y, blk_s, blk_s],
        out_shape=(jax.ShapeDtypeStruct((N, Cout, HW), jnp.bfloat16),
                   stat_shape, stat_shape),
        compiler_params=par,
        cost_estimate=conv_cost(Cin),
    )(x, w1_2d, masks)
    scale1, shift1 = _fold_bn(s1, q1, g1, be1, count)

    # ---- pass 2: BN1 + ReLU (folded, f32 VPU) -> conv2 + partial stats ----
    y2, s2, q2 = pl.pallas_call(
        functools.partial(_bn_conv_stats_kernel, H=H, W=W),
        grid=(N,),
        in_specs=[blk_y, blk_v, blk_v, blk_w2, blk_m],
        out_specs=[blk_y, blk_s, blk_s],
        out_shape=(jax.ShapeDtypeStruct((N, Cout, HW), jnp.bfloat16),
                   stat_shape, stat_shape),
        compiler_params=par,
        cost_estimate=conv_cost(Cout),
    )(y1, scale1, shift1, w2_2d, masks)
    scale2, shift2 = _fold_bn(s2, q2, g2, be2, count)

    # ---- pass 3: BN2 + ReLU (elementwise, lane-dense, batch axis parallel) ----
    out = pl.pallas_call(
        _bn_relu_kernel,
        grid=(N,),
        in_specs=[blk_y, blk_v, blk_v],
        out_specs=blk_y,
        out_shape=jax.ShapeDtypeStruct((N, Cout, HW), jnp.float32),
        compiler_params=par,
        cost_estimate=pl.CostEstimate(flops=3 * N * Cout * HW, transcendentals=0,
                                      bytes_accessed=6 * N * Cout * HW),
    )(y2, scale2, shift2)

    # (N, Cout, H*W) -> (N, Cout, H, W): byte-identical, free reshape (no transpose).
    return out.reshape(N, Cout, H, W)


def _reference(x_nchw, params):
    """Pure-JAX f32 reference (lax conv + bias + batch-stat BN + ReLU) = PyTorch training fwd."""
    w1, b1, g1, be1, w2, b2, g2, be2 = params

    def block(x, w, b, g, be):
        y = lax.conv_general_dilated(
            x, w, window_strides=(1, 1), padding='SAME',
            dimension_numbers=('NCHW', 'OIHW', 'NCHW'))
        y = y + b[None, :, None, None]
        mean = jnp.mean(y, axis=(0, 2, 3), keepdims=True)
        var = jnp.mean((y - mean) ** 2, axis=(0, 2, 3), keepdims=True)
        y = (y - mean) * lax.rsqrt(var + EPS)
        y = y * g[None, :, None, None] + be[None, :, None, None]
        return jnp.maximum(y, 0.0)

    y = block(x_nchw, w1, b1, g1, be1)
    return block(y, w2, b2, g2, be2)


def init_params(key, in_channels, out_channels):
    k1, k2, k3, k4 = jax.random.split(key, 4)
    w1 = 0.1 * jax.random.normal(k1, (out_channels, in_channels, 3, 3), jnp.float32)
    b1 = 0.1 * jax.random.normal(k2, (out_channels,), jnp.float32)
    g1 = jnp.ones((out_channels,), jnp.float32)    # BatchNorm weight init
    be1 = jnp.zeros((out_channels,), jnp.float32)  # BatchNorm bias init
    w2 = 0.1 * jax.random.normal(k3, (out_channels, out_channels, 3, 3), jnp.float32)
    b2 = 0.1 * jax.random.normal(k4, (out_channels,), jnp.float32)
    g2 = jnp.ones((out_channels,), jnp.float32)
    be2 = jnp.zeros((out_channels,), jnp.float32)
    return (w1, b1, g1, be1, w2, b2, g2, be2)


if __name__ == "__main__":
    key = jax.random.PRNGKey(0)
    kx, kp = jax.random.split(key)

    N, Cin, Cout, H, W = 2, 4, 8, 16, 16
    x = jax.random.normal(kx, (N, Cin, H, W), jnp.float32)
    params = init_params(kp, Cin, Cout)

    out = jax.block_until_ready(double_conv(x, params))
    ref = jax.block_until_ready(_reference(x, params))

    assert out.shape == (N, Cout, H, W)
    # bf16 MXU operands + bf16 HBM intermediates -> mixed-precision tolerance vs f32 ref.
    max_err = jnp.max(jnp.abs(out - ref))
    assert jnp.allclose(out, ref, atol=5e-2, rtol=5e-2), f"max err {max_err}"
    print("KERNEL_OK")
</pallas_src>

<mosaic_0001>
module attributes {stable_mosaic.version = 11 : i64} {
  func.func @_conv_stats_kernel(%arg0: i32, %arg1: memref<1x4x256xf32, #tpu.memory_space<vmem>>, %arg2: memref<8x36xbf16, #tpu.memory_space<vmem>>, %arg3: memref<9x256xf32, #tpu.memory_space<vmem>>, %arg4: memref<1x8x256xbf16, #tpu.memory_space<vmem>>, %arg5: memref<1x8x1xf32, #tpu.memory_space<vmem>>, %arg6: memref<1x8x1xf32, #tpu.memory_space<vmem>>) attributes {dimension_semantics = [#tpu.dimension_semantics<parallel>], iteration_bounds = array<i64: 2>, scalar_prefetch = 0 : i64, scratch_operands = 0 : i64, tpu.core_type = #tpu.core_type<tc>, window_params = [{transform_indices = @transform_0, window_bounds = array<i64: 1, 4, 256>}, {pipeline_mode = #tpu.pipeline_mode<synchronous>, transform_indices = @transform_1, window_bounds = array<i64: 8, 36>}, {pipeline_mode = #tpu.pipeline_mode<synchronous>, transform_indices = @transform_2, window_bounds = array<i64: 9, 256>}, {transform_indices = @transform_3, window_bounds = array<i64: 1, 8, 256>}, {transform_indices = @transform_4, window_bounds = array<i64: 1, 8, 1>}, {transform_indices = @transform_5, window_bounds = array<i64: 1, 8, 1>}]} {
    %c0 = arith.constant 0 : index
    %c0_0 = arith.constant 0 : index
    %c0_1 = arith.constant 0 : index
    %0 = vector.load %arg1[%c0, %c0_0, %c0_1] : memref<1x4x256xf32, #tpu.memory_space<vmem>>, vector<1x4x256xf32>
    %1 = vector.shape_cast %0 : vector<1x4x256xf32> to vector<4x256xf32>
    %c0_2 = arith.constant 0 : index
    %c0_3 = arith.constant 0 : index
    %2 = vector.load %arg3[%c0_2, %c0_3] : memref<9x256xf32, #tpu.memory_space<vmem>>, vector<9x256xf32>
    %cst = arith.constant 0.000000e+00 : f32
    %3 = vector.broadcast %cst : f32 to vector<4x17xf32>
    %4 = tpu.concatenate %3, %1, %3 in 1 : vector<4x17xf32>, vector<4x256xf32>, vector<4x17xf32> -> vector<4x290xf32>
    %5 = vector.extract_strided_slice %4 {offsets = [0, 0], sizes = [4, 256], strides = [1, 1]} : vector<4x290xf32> to vector<4x256xf32>
    %6 = vector.extract_strided_slice %2 {offsets = [0, 0], sizes = [1, 256], strides = [1, 1]} : vector<9x256xf32> to vector<1x256xf32>
    %7 = vector.broadcast %6 : vector<1x256xf32> to vector<4x256xf32>
    %8 = arith.mulf %5, %7 : vector<4x256xf32>
    %9 = vector.extract_strided_slice %4 {offsets = [0, 1], sizes = [4, 256], strides = [1, 1]} : vector<4x290xf32> to vector<4x256xf32>
    %10 = vector.extract_strided_slice %2 {offsets = [1, 0], sizes = [1, 256], strides = [1, 1]} : vector<9x256xf32> to vector<1x256xf32>
    %11 = vector.broadcast %10 : vector<1x256xf32> to vector<4x256xf32>
    %12 = arith.mulf %9, %11 : vector<4x256xf32>
    %13 = vector.extract_strided_slice %4 {offsets = [0, 2], sizes = [4, 256], strides = [1, 1]} : vector<4x290xf32> to vector<4x256xf32>
    %14 = vector.extract_strided_slice %2 {offsets = [2, 0], sizes = [1, 256], strides = [1, 1]} : vector<9x256xf32> to vector<1x256xf32>
    %15 = vector.broadcast %14 : vector<1x256xf32> to vector<4x256xf32>
    %16 = arith.mulf %13, %15 : vector<4x256xf32>
    %17 = vector.extract_strided_slice %4 {offsets = [0, 16], sizes = [4, 256], strides = [1, 1]} : vector<4x290xf32> to vector<4x256xf32>
    %18 = vector.extract_strided_slice %2 {offsets = [3, 0], sizes = [1, 256], strides = [1, 1]} : vector<9x256xf32> to vector<1x256xf32>
    %19 = vector.broadcast %18 : vector<1x256xf32> to vector<4x256xf32>
    %20 = arith.mulf %17, %19 : vector<4x256xf32>
    %21 = vector.extract_strided_slice %4 {offsets = [0, 17], sizes = [4, 256], strides = [1, 1]} : vector<4x290xf32> to vector<4x256xf32>
    %22 = vector.extract_strided_slice %2 {offsets = [4, 0], sizes = [1, 256], strides = [1, 1]} : vector<9x256xf32> to vector<1x256xf32>
    %23 = vector.broadcast %22 : vector<1x256xf32> to vector<4x256xf32>
    %24 = arith.mulf %21, %23 : vector<4x256xf32>
    %25 = vector.extract_strided_slice %4 {offsets = [0, 18], sizes = [4, 256], strides = [1, 1]} : vector<4x290xf32> to vector<4x256xf32>
    %26 = vector.extract_strided_slice %2 {offsets = [5, 0], sizes = [1, 256], strides = [1, 1]} : vector<9x256xf32> to vector<1x256xf32>
    %27 = vector.broadcast %26 : vector<1x256xf32> to vector<4x256xf32>
    %28 = arith.mulf %25, %27 : vector<4x256xf32>
    %29 = vector.extract_strided_slice %4 {offsets = [0, 32], sizes = [4, 256], strides = [1, 1]} : vector<4x290xf32> to vector<4x256xf32>
    %30 = vector.extract_strided_slice %2 {offsets = [6, 0], sizes = [1, 256], strides = [1, 1]} : vector<9x256xf32> to vector<1x256xf32>
    %31 = vector.broadcast %30 : vector<1x256xf32> to vector<4x256xf32>
    %32 = arith.mulf %29, %31 : vector<4x256xf32>
    %33 = vector.extract_strided_slice %4 {offsets = [0, 33], sizes = [4, 256], strides = [1, 1]} : vector<4x290xf32> to vector<4x256xf32>
    %34 = vector.extract_strided_slice %2 {offsets = [7, 0], sizes = [1, 256], strides = [1, 1]} : vector<9x256xf32> to vector<1x256xf32>
    %35 = vector.broadcast %34 : vector<1x256xf32> to vector<4x256xf32>
    %36 = arith.mulf %33, %35 : vector<4x256xf32>
    %37 = vector.extract_strided_slice %4 {offsets = [0, 34], sizes = [4, 256], strides = [1, 1]} : vector<4x290xf32> to vector<4x256xf32>
    %38 = vector.extract_strided_slice %2 {offsets = [8, 0], sizes = [1, 256], strides = [1, 1]} : vector<9x256xf32> to vector<1x256xf32>
    %39 = vector.broadcast %38 : vector<1x256xf32> to vector<4x256xf32>
    %40 = arith.mulf %37, %39 : vector<4x256xf32>
    %41 = tpu.concatenate %8, %12, %16, %20, %24, %28, %32, %36, %40 in 0 : vector<4x256xf32>, vector<4x256xf32>, vector<4x256xf32>, vector<4x256xf32>, vector<4x256xf32>, vector<4x256xf32>, vector<4x256xf32>, vector<4x256xf32>, vector<4x256xf32> -> vector<36x256xf32>
    %c0_4 = arith.constant 0 : index
    %c0_5 = arith.constant 0 : index
    %42 = vector.load %arg2[%c0_4, %c0_5] : memref<8x36xbf16, #tpu.memory_space<vmem>>, vector<8x36xbf16>
    %43 = arith.truncf %41 : vector<36x256xf32> to vector<36x256xbf16>
    %cst_6 = arith.constant dense<0.000000e+00> : vector<8x256xf32>
    %44 = tpu.matmul %42, %43, %cst_6 {dimension_numbers = #tpu.dot_dimension_numbers<[1], [0], [0], [1], [0, 0, 1, 1], [], []>} : vector<8x36xbf16>, vector<36x256xbf16>, vector<8x256xf32> -> vector<8x256xf32>
    %45 = arith.truncf %44 : vector<8x256xf32> to vector<8x256xbf16>
    %c0_7 = arith.constant 0 : index
    %c0_8 = arith.constant 0 : index
    %c0_9 = arith.constant 0 : index
    %46 = vector.load %arg4[%c0_7, %c0_8, %c0_9] : memref<1x8x256xbf16, #tpu.memory_space<vmem>>, vector<1x8x256xbf16>
    %47 = vector.shape_cast %46 : vector<1x8x256xbf16> to vector<8x256xbf16>
    %48 = vector.shape_cast %45 : vector<8x256xbf16> to vector<1x8x256xbf16>
    tpu.vector_store %arg4[%c0_7, %c0_8, %c0_9], %48 {strides = array<i32>} : memref<1x8x256xbf16, #tpu.memory_space<vmem>>, vector<1x8x256xbf16>,
    %cst_10 = arith.constant dense<0.000000e+00> : vector<8xf32>
    %49 = vector.multi_reduction <add>, %44, %cst_10 [1] : vector<8x256xf32> to vector<8xf32>
    %50 = vector.shape_cast %49 : vector<8xf32> to vector<8x1xf32>
    %c0_11 = arith.constant 0 : index
    %c0_12 = arith.constant 0 : index
    %c0_13 = arith.constant 0 : index
    %51 = vector.load %arg5[%c0_11, %c0_12, %c0_13] : memref<1x8x1xf32, #tpu.memory_space<vmem>>, vector<1x8x1xf32>
    %52 = vector.shape_cast %51 : vector<1x8x1xf32> to vector<8x1xf32>
    %53 = vector.shape_cast %50 : vector<8x1xf32> to vector<1x8x1xf32>
    tpu.vector_store %arg5[%c0_11, %c0_12, %c0_13], %53 {strides = array<i32>} : memref<1x8x1xf32, #tpu.memory_space<vmem>>, vector<1x8x1xf32>,
    %54 = arith.mulf %44, %44 : vector<8x256xf32>
    %cst_14 = arith.constant dense<0.000000e+00> : vector<8xf32>
    %55 = vector.multi_reduction <add>, %54, %cst_14 [1] : vector<8x256xf32> to vector<8xf32>
    %56 = vector.shape_cast %55 : vector<8xf32> to vector<8x1xf32>
    %c0_15 = arith.constant 0 : index
    %c0_16 = arith.constant 0 : index
    %c0_17 = arith.constant 0 : index
    %57 = vector.load %arg6[%c0_15, %c0_16, %c0_17] : memref<1x8x1xf32, #tpu.memory_space<vmem>>, vector<1x8x1xf32>
    %58 = vector.shape_cast %57 : vector<1x8x1xf32> to vector<8x1xf32>
    %59 = vector.shape_cast %56 : vector<8x1xf32> to vector<1x8x1xf32>
    tpu.vector_store %arg6[%c0_15, %c0_16, %c0_17], %59 {strides = array<i32>} : memref<1x8x1xf32, #tpu.memory_space<vmem>>, vector<1x8x1xf32>,
    return
  }
  func.func @transform_0(%arg0: i32) -> (i32, i32, i32) {
    %c0_i32 = arith.constant 0 : i32
    %c0_i32_0 = arith.constant 0 : i32
    %c0_i32_1 = arith.constant 0 : i32
    return %arg0, %c0_i32, %c0_i32_0 : i32, i32, i32
  }
  func.func @transform_1(%arg0: i32) -> (i32, i32) {
    %c0_i32 = arith.constant 0 : i32
    %c0_i32_0 = arith.constant 0 : i32
    %c0_i32_1 = arith.constant 0 : i32
    return %c0_i32, %c0_i32_0 : i32, i32
  }
  func.func @transform_2(%arg0: i32) -> (i32, i32) {
    %c0_i32 = arith.constant 0 : i32
    %c0_i32_0 = arith.constant 0 : i32
    %c0_i32_1 = arith.constant 0 : i32
    return %c0_i32, %c0_i32_0 : i32, i32
  }
  func.func @transform_3(%arg0: i32) -> (i32, i32, i32) {
    %c0_i32 = arith.constant 0 : i32
    %c0_i32_0 = arith.constant 0 : i32
    %c0_i32_1 = arith.constant 0 : i32
    return %arg0, %c0_i32, %c0_i32_0 : i32, i32, i32
  }
  func.func @transform_4(%arg0: i32) -> (i32, i32, i32) {
    %c0_i32 = arith.constant 0 : i32
    %c0_i32_0 = arith.constant 0 : i32
    %c0_i32_1 = arith.constant 0 : i32
    return %arg0, %c0_i32, %c0_i32_0 : i32, i32, i32
  }
  func.func @transform_5(%arg0: i32) -> (i32, i32, i32) {
    %c0_i32 = arith.constant 0 : i32
    %c0_i32_0 = arith.constant 0 : i32
    %c0_i32_1 = arith.constant 0 : i32
    return %arg0, %c0_i32, %c0_i32_0 : i32, i32, i32
  }
}

module attributes {stable_mosaic.version = 11 : i64} {
  func.func @_bn_conv_stats_kernel(%arg0: i32, %arg1: memref<1x8x256xbf16, #tpu.memory_space<vmem>>, %arg2: memref<8x1xf32, #tpu.memory_space<vmem>>, %arg3: memref<8x1xf32, #tpu.memory_space<vmem>>, %arg4: memref<8x72xbf16, #tpu.memory_space<vmem>>, %arg5: memref<9x256xf32, #tpu.memory_space<vmem>>, %arg6: memref<1x8x256xbf16, #tpu.memory_space<vmem>>, %arg7: memref<1x8x1xf32, #tpu.memory_space<vmem>>, %arg8: memref<1x8x1xf32, #tpu.memory_space<vmem>>) attributes {dimension_semantics = [#tpu.dimension_semantics<parallel>], iteration_bounds = array<i64: 2>, scalar_prefetch = 0 : i64, scratch_operands = 0 : i64, tpu.core_type = #tpu.core_type<tc>, window_params = [{transform_indices = @transform_0, window_bounds = array<i64: 1, 8, 256>}, {pipeline_mode = #tpu.pipeline_mode<synchronous>, transform_indices = @transform_1, window_bounds = array<i64: 8, 1>}, {pipeline_mode = #tpu.pipeline_mode<synchronous>, transform_indices = @transform_2, window_bounds = array<i64: 8, 1>}, {pipeline_mode = #tpu.pipeline_mode<synchronous>, transform_indices = @transform_3, window_bounds = array<i64: 8, 72>}, {pipeline_mode = #tpu.pipeline_mode<synchronous>, transform_indices = @transform_4, window_bounds = array<i64: 9, 256>}, {transform_indices = @transform_5, window_bounds = array<i64: 1, 8, 256>}, {transform_indices = @transform_6, window_bounds = array<i64: 1, 8, 1>}, {transform_indices = @transform_7, window_bounds = array<i64: 1, 8, 1>}]} {
    %c0 = arith.constant 0 : index
    %c0_0 = arith.constant 0 : index
    %c0_1 = arith.constant 0 : index
    %0 = vector.load %arg1[%c0, %c0_0, %c0_1] : memref<1x8x256xbf16, #tpu.memory_space<vmem>>, vector<1x8x256xbf16>
    %1 = vector.shape_cast %0 : vector<1x8x256xbf16> to vector<8x256xbf16>
    %2 = arith.extf %1 : vector<8x256xbf16> to vector<8x256xf32>
    %c0_2 = arith.constant 0 : index
    %c0_3 = arith.constant 0 : index
    %3 = vector.load %arg2[%c0_2, %c0_3] : memref<8x1xf32, #tpu.memory_space<vmem>>, vector<8x1xf32>
    %4 = vector.broadcast %3 : vector<8x1xf32> to vector<8x256xf32>
    %5 = arith.mulf %2, %4 : vector<8x256xf32>
    %c0_4 = arith.constant 0 : index
    %c0_5 = arith.constant 0 : index
    %6 = vector.load %arg3[%c0_4, %c0_5] : memref<8x1xf32, #tpu.memory_space<vmem>>, vector<8x1xf32>
    %7 = vector.broadcast %6 : vector<8x1xf32> to vector<8x256xf32>
    %8 = arith.addf %5, %7 : vector<8x256xf32>
    %cst = arith.constant 0.000000e+00 : f32
    %9 = vector.broadcast %cst : f32 to vector<8x256xf32>
    %10 = arith.maximumf %8, %9 : vector<8x256xf32>
    %c0_6 = arith.constant 0 : index
    %c0_7 = arith.constant 0 : index
    %11 = vector.load %arg5[%c0_6, %c0_7] : memref<9x256xf32, #tpu.memory_space<vmem>>, vector<9x256xf32>
    %cst_8 = arith.constant 0.000000e+00 : f32
    %12 = vector.broadcast %cst_8 : f32 to vector<8x17xf32>
    %13 = tpu.concatenate %12, %10, %12 in 1 : vector<8x17xf32>, vector<8x256xf32>, vector<8x17xf32> -> vector<8x290xf32>
    %14 = vector.extract_strided_slice %13 {offsets = [0, 0], sizes = [8, 256], strides = [1, 1]} : vector<8x290xf32> to vector<8x256xf32>
    %15 = vector.extract_strided_slice %11 {offsets = [0, 0], sizes = [1, 256], strides = [1, 1]} : vector<9x256xf32> to vector<1x256xf32>
    %16 = vector.broadcast %15 : vector<1x256xf32> to vector<8x256xf32>
    %17 = arith.mulf %14, %16 : vector<8x256xf32>
    %18 = vector.extract_strided_slice %13 {offsets = [0, 1], sizes = [8, 256], strides = [1, 1]} : vector<8x290xf32> to vector<8x256xf32>
    %19 = vector.extract_strided_slice %11 {offsets = [1, 0], sizes = [1, 256], strides = [1, 1]} : vector<9x256xf32> to vector<1x256xf32>
    %20 = vector.broadcast %19 : vector<1x256xf32> to vector<8x256xf32>
    %21 = arith.mulf %18, %20 : vector<8x256xf32>
    %22 = vector.extract_strided_slice %13 {offsets = [0, 2], sizes = [8, 256], strides = [1, 1]} : vector<8x290xf32> to vector<8x256xf32>
    %23 = vector.extract_strided_slice %11 {offsets = [2, 0], sizes = [1, 256], strides = [1, 1]} : vector<9x256xf32> to vector<1x256xf32>
    %24 = vector.broadcast %23 : vector<1x256xf32> to vector<8x256xf32>
    %25 = arith.mulf %22, %24 : vector<8x256xf32>
    %26 = vector.extract_strided_slice %13 {offsets = [0, 16], sizes = [8, 256], strides = [1, 1]} : vector<8x290xf32> to vector<8x256xf32>
    %27 = vector.extract_strided_slice %11 {offsets = [3, 0], sizes = [1, 256], strides = [1, 1]} : vector<9x256xf32> to vector<1x256xf32>
    %28 = vector.broadcast %27 : vector<1x256xf32> to vector<8x256xf32>
    %29 = arith.mulf %26, %28 : vector<8x256xf32>
    %30 = vector.extract_strided_slice %13 {offsets = [0, 17], sizes = [8, 256], strides = [1, 1]} : vector<8x290xf32> to vector<8x256xf32>
    %31 = vector.extract_strided_slice %11 {offsets = [4, 0], sizes = [1, 256], strides = [1, 1]} : vector<9x256xf32> to vector<1x256xf32>
    %32 = vector.broadcast %31 : vector<1x256xf32> to vector<8x256xf32>
    %33 = arith.mulf %30, %32 : vector<8x256xf32>
    %34 = vector.extract_strided_slice %13 {offsets = [0, 18], sizes = [8, 256], strides = [1, 1]} : vector<8x290xf32> to vector<8x256xf32>
    %35 = vector.extract_strided_slice %11 {offsets = [5, 0], sizes = [1, 256], strides = [1, 1]} : vector<9x256xf32> to vector<1x256xf32>
    %36 = vector.broadcast %35 : vector<1x256xf32> to vector<8x256xf32>
    %37 = arith.mulf %34, %36 : vector<8x256xf32>
    %38 = vector.extract_strided_slice %13 {offsets = [0, 32], sizes = [8, 256], strides = [1, 1]} : vector<8x290xf32> to vector<8x256xf32>
    %39 = vector.extract_strided_slice %11 {offsets = [6, 0], sizes = [1, 256], strides = [1, 1]} : vector<9x256xf32> to vector<1x256xf32>
    %40 = vector.broadcast %39 : vector<1x256xf32> to vector<8x256xf32>
    %41 = arith.mulf %38, %40 : vector<8x256xf32>
    %42 = vector.extract_strided_slice %13 {offsets = [0, 33], sizes = [8, 256], strides = [1, 1]} : vector<8x290xf32> to vector<8x256xf32>
    %43 = vector.extract_strided_slice %11 {offsets = [7, 0], sizes = [1, 256], strides = [1, 1]} : vector<9x256xf32> to vector<1x256xf32>
    %44 = vector.broadcast %43 : vector<1x256xf32> to vector<8x256xf32>
    %45 = arith.mulf %42, %44 : vector<8x256xf32>
    %46 = vector.extract_strided_slice %13 {offsets = [0, 34], sizes = [8, 256], strides = [1, 1]} : vector<8x290xf32> to vector<8x256xf32>
    %47 = vector.extract_strided_slice %11 {offsets = [8, 0], sizes = [1, 256], strides = [1, 1]} : vector<9x256xf32> to vector<1x256xf32>
    %48 = vector.broadcast %47 : vector<1x256xf32> to vector<8x256xf32>
    %49 = arith.mulf %46, %48 : vector<8x256xf32>
    %50 = tpu.concatenate %17, %21, %25, %29, %33, %37, %41, %45, %49 in 0 : vector<8x256xf32>, vector<8x256xf32>, vector<8x256xf32>, vector<8x256xf32>, vector<8x256xf32>, vector<8x256xf32>, vector<8x256xf32>, vector<8x256xf32>, vector<8x256xf32> -> vector<72x256xf32>
    %c0_9 = arith.constant 0 : index
    %c0_10 = arith.constant 0 : index
    %51 = vector.load %arg4[%c0_9, %c0_10] : memref<8x72xbf16, #tpu.memory_space<vmem>>, vector<8x72xbf16>
    %52 = arith.truncf %50 : vector<72x256xf32> to vector<72x256xbf16>
    %cst_11 = arith.constant dense<0.000000e+00> : vector<8x256xf32>
    %53 = tpu.matmul %51, %52, %cst_11 {dimension_numbers = #tpu.dot_dimension_numbers<[1], [0], [0], [1], [0, 0, 1, 1], [], []>} : vector<8x72xbf16>, vector<72x256xbf16>, vector<8x256xf32> -> vector<8x256xf32>
    %54 = arith.truncf %53 : vector<8x256xf32> to vector<8x256xbf16>
    %c0_12 = arith.constant 0 : index
    %c0_13 = arith.constant 0 : index
    %c0_14 = arith.constant 0 : index
    %55 = vector.load %arg6[%c0_12, %c0_13, %c0_14] : memref<1x8x256xbf16, #tpu.memory_space<vmem>>, vector<1x8x256xbf16>
    %56 = vector.shape_cast %55 : vector<1x8x256xbf16> to vector<8x256xbf16>
    %57 = vector.shape_cast %54 : vector<8x256xbf16> to vector<1x8x256xbf16>
    tpu.vector_store %arg6[%c0_12, %c0_13, %c0_14], %57 {strides = array<i32>} : memref<1x8x256xbf16, #tpu.memory_space<vmem>>, vector<1x8x256xbf16>,
    %cst_15 = arith.constant dense<0.000000e+00> : vector<8xf32>
    %58 = vector.multi_reduction <add>, %53, %cst_15 [1] : vector<8x256xf32> to vector<8xf32>
    %59 = vector.shape_cast %58 : vector<8xf32> to vector<8x1xf32>
    %c0_16 = arith.constant 0 : index
    %c0_17 = arith.constant 0 : index
    %c0_18 = arith.constant 0 : index
    %60 = vector.load %arg7[%c0_16, %c0_17, %c0_18] : memref<1x8x1xf32, #tpu.memory_space<vmem>>, vector<1x8x1xf32>
    %61 = vector.shape_cast %60 : vector<1x8x1xf32> to vector<8x1xf32>
    %62 = vector.shape_cast %59 : vector<8x1xf32> to vector<1x8x1xf32>
    tpu.vector_store %arg7[%c0_16, %c0_17, %c0_18], %62 {strides = array<i32>} : memref<1x8x1xf32, #tpu.memory_space<vmem>>, vector<1x8x1xf32>,
    %63 = arith.mulf %53, %53 : vector<8x256xf32>
    %cst_19 = arith.constant dense<0.000000e+00> : vector<8xf32>
    %64 = vector.multi_reduction <add>, %63, %cst_19 [1] : vector<8x256xf32> to vector<8xf32>
    %65 = vector.shape_cast %64 : vector<8xf32> to vector<8x1xf32>
    %c0_20 = arith.constant 0 : index
    %c0_21 = arith.constant 0 : index
    %c0_22 = arith.constant 0 : index
    %66 = vector.load %arg8[%c0_20, %c0_21, %c0_22] : memref<1x8x1xf32, #tpu.memory_space<vmem>>, vector<1x8x1xf32>
    %67 = vector.shape_cast %66 : vector<1x8x1xf32> to vector<8x1xf32>
    %68 = vector.shape_cast %65 : vector<8x1xf32> to vector<1x8x1xf32>
    tpu.vector_store %arg8[%c0_20, %c0_21, %c0_22], %68 {strides = array<i32>} : memref<1x8x1xf32, #tpu.memory_space<vmem>>, vector<1x8x1xf32>,
    return
  }
  func.func @transform_0(%arg0: i32) -> (i32, i32, i32) {
    %c0_i32 = arith.constant 0 : i32
    %c0_i32_0 = arith.constant 0 : i32
    %c0_i32_1 = arith.constant 0 : i32
    return %arg0, %c0_i32, %c0_i32_0 : i32, i32, i32
  }
  func.func @transform_1(%arg0: i32) -> (i32, i32) {
    %c0_i32 = arith.constant 0 : i32
    %c0_i32_0 = arith.constant 0 : i32
    %c0_i32_1 = arith.constant 0 : i32
    return %c0_i32, %c0_i32_0 : i32, i32
  }
  func.func @transform_2(%arg0: i32) -> (i32, i32) {
    %c0_i32 = arith.constant 0 : i32
    %c0_i32_0 = arith.constant 0 : i32
    %c0_i32_1 = arith.constant 0 : i32
    return %c0_i32, %c0_i32_0 : i32, i32
  }
  func.func @transform_3(%arg0: i32) -> (i32, i32) {
    %c0_i32 = arith.constant 0 : i32
    %c0_i32_0 = arith.constant 0 : i32
    %c0_i32_1 = arith.constant 0 : i32
    return %c0_i32, %c0_i32_0 : i32, i32
  }
  func.func @transform_4(%arg0: i32) -> (i32, i32) {
    %c0_i32 = arith.constant 0 : i32
    %c0_i32_0 = arith.constant 0 : i32
    %c0_i32_1 = arith.constant 0 : i32
    return %c0_i32, %c0_i32_0 : i32, i32
  }
  func.func @transform_5(%arg0: i32) -> (i32, i32, i32) {
    %c0_i32 = arith.constant 0 : i32
    %c0_i32_0 = arith.constant 0 : i32
    %c0_i32_1 = arith.constant 0 : i32
    return %arg0, %c0_i32, %c0_i32_0 : i32, i32, i32
  }
  func.func @transform_6(%arg0: i32) -> (i32, i32, i32) {
    %c0_i32 = arith.constant 0 : i32
    %c0_i32_0 = arith.constant 0 : i32
    %c0_i32_1 = arith.constant 0 : i32
    return %arg0, %c0_i32, %c0_i32_0 : i32, i32, i32
  }
  func.func @transform_7(%arg0: i32) -> (i32, i32, i32) {
    %c0_i32 = arith.constant 0 : i32
    %c0_i32_0 = arith.constant 0 : i32
    %c0_i32_1 = arith.constant 0 : i32
    return %arg0, %c0_i32, %c0_i32_0 : i32, i32, i32
  }
}

module attributes {stable_mosaic.version = 11 : i64} {
  func.func @_bn_relu_kernel(%arg0: i32, %arg1: memref<1x8x256xbf16, #tpu.memory_space<vmem>>, %arg2: memref<8x1xf32, #tpu.memory_space<vmem>>, %arg3: memref<8x1xf32, #tpu.memory_space<vmem>>, %arg4: memref<1x8x256xf32, #tpu.memory_space<vmem>>) attributes {dimension_semantics = [#tpu.dimension_semantics<parallel>], iteration_bounds = array<i64: 2>, scalar_prefetch = 0 : i64, scratch_operands = 0 : i64, tpu.core_type = #tpu.core_type<tc>, window_params = [{transform_indices = @transform_0, window_bounds = array<i64: 1, 8, 256>}, {pipeline_mode = #tpu.pipeline_mode<synchronous>, transform_indices = @transform_1, window_bounds = array<i64: 8, 1>}, {pipeline_mode = #tpu.pipeline_mode<synchronous>, transform_indices = @transform_2, window_bounds = array<i64: 8, 1>}, {transform_indices = @transform_3, window_bounds = array<i64: 1, 8, 256>}]} {
    %c0 = arith.constant 0 : index
    %c0_0 = arith.constant 0 : index
    %c0_1 = arith.constant 0 : index
    %0 = vector.load %arg1[%c0, %c0_0, %c0_1] : memref<1x8x256xbf16, #tpu.memory_space<vmem>>, vector<1x8x256xbf16>
    %1 = vector.shape_cast %0 : vector<1x8x256xbf16> to vector<8x256xbf16>
    %2 = arith.extf %1 : vector<8x256xbf16> to vector<8x256xf32>
    %c0_2 = arith.constant 0 : index
    %c0_3 = arith.constant 0 : index
    %3 = vector.load %arg2[%c0_2, %c0_3] : memref<8x1xf32, #tpu.memory_space<vmem>>, vector<8x1xf32>
    %4 = vector.broadcast %3 : vector<8x1xf32> to vector<8x256xf32>
    %5 = arith.mulf %2, %4 : vector<8x256xf32>
    %c0_4 = arith.constant 0 : index
    %c0_5 = arith.constant 0 : index
    %6 = vector.load %arg3[%c0_4, %c0_5] : memref<8x1xf32, #tpu.memory_space<vmem>>, vector<8x1xf32>
    %7 = vector.broadcast %6 : vector<8x1xf32> to vector<8x256xf32>
    %8 = arith.addf %5, %7 : vector<8x256xf32>
    %cst = arith.constant 0.000000e+00 : f32
    %9 = vector.broadcast %cst : f32 to vector<8x256xf32>
    %10 = arith.maximumf %8, %9 : vector<8x256xf32>
    %c0_6 = arith.constant 0 : index
    %c0_7 = arith.constant 0 : index
    %c0_8 = arith.constant 0 : index
    %11 = vector.load %arg4[%c0_6, %c0_7, %c0_8] : memref<1x8x256xf32, #tpu.memory_space<vmem>>, vector<1x8x256xf32>
    %12 = vector.shape_cast %11 : vector<1x8x256xf32> to vector<8x256xf32>
    %13 = vector.shape_cast %10 : vector<8x256xf32> to vector<1x8x256xf32>
    tpu.vector_store %arg4[%c0_6, %c0_7, %c0_8], %13 {strides = array<i32>} : memref<1x8x256xf32, #tpu.memory_space<vmem>>, vector<1x8x256xf32>,
    return
  }
  func.func @transform_0(%arg0: i32) -> (i32, i32, i32) {
    %c0_i32 = arith.constant 0 : i32
    %c0_i32_0 = arith.constant 0 : i32
    %c0_i32_1 = arith.constant 0 : i32
    return %arg0, %c0_i32, %c0_i32_0 : i32, i32, i32
  }
  func.func @transform_1(%arg0: i32) -> (i32, i32) {
    %c0_i32 = arith.constant 0 : i32
    %c0_i32_0 = arith.constant 0 : i32
    %c0_i32_1 = arith.constant 0 : i32
    return %c0_i32, %c0_i32_0 : i32, i32
  }
  func.func @transform_2(%arg0: i32) -> (i32, i32) {
    %c0_i32 = arith.constant 0 : i32
    %c0_i32_0 = arith.constant 0 : i32
    %c0_i32_1 = arith.constant 0 : i32
    return %c0_i32, %c0_i32_0 : i32, i32
  }
  func.func @transform_3(%arg0: i32) -> (i32, i32, i32) {
    %c0_i32 = arith.constant 0 : i32
    %c0_i32_0 = arith.constant 0 : i32
    %c0_i32_1 = arith.constant 0 : i32
    return %arg0, %c0_i32, %c0_i32_0 : i32, i32, i32
  }
}

</mosaic_0001>

<bundles_post_ra>
// kernel: double_conv.5
= control target key start
LH: loop header
LB: loop body
LE: loop exit
PB: predicated region body
PF: predicated region fallthrough
CT: control target
= control target key end

     0   :  { %s301_s12 = smov 0   ;;  %s324_s0 = inlined_call_operand.vmem [shape: bf16[2,8,256], index: 0, kind: input, shape index: {}]   ;;  %s325_s1 = inlined_call_operand.vmem [shape: f32[8,1], index: 1, kind: input, shape index: {}]   ;;  %s326_s2 = inlined_call_operand.vmem [shape: f32[8,1], index: 2, kind: input, shape index: {}]   ;;  %s327_s3 = inlined_call_operand.vmem [shape: f32[2,8,256], index: 3, kind: output, shape index: {}]  }
   0x1 LB: > { %s249_s13 = sadd.s32 4294967295, %s278_s12   ;;  %p253_p0 = scmp.ge.s32.totalorder %s278_s12, 1  ;;  %s278_s12 = sphi %s301_s12, %s13_s12  }
   0x2   : > { %p137_p1 = scmp.lt.s32.totalorder %s278_s12, 3 }
   0x4   : > { %p138_p2 = pnand %p253_p0, %p137_p1 }
   0x5   : > { %p161_p3 = scmp.lt.s32.totalorder (!%p138_p2), %s249_s13, 1 }
   0x6   : > { %141 = sbr.rel (%p138_p2) target bundleno = 146 (0x92), region = 32 }
   0xb   : > { %v174_v0 = vld [vmem:[%s325_s1] sm:$0xff]  ;;  %v280_v1 = vmov 0   ;;  %s329_s13 = smov (!%p161_p3, %s249_s13), 1 }
   0xc   : > { %271 = vset.pattern.permute.xlu0 %v280_v1  ;;  %v182_v2 = vld [vmem:[%s326_s2] sm:$0xff]  ;;  %s260_s18 = sshll.u32 %s329_s13, 3  ;;  %s261_s22 = sshll.u32 %s329_s13, 4 }
   0xd   : > { %177 = vperm.xlu0 %271, %v174_v0   ;;  %s165_s21 = scalar_lea.vmem %s324_s0, %s260_s18  ;;  %s170_s25 = scalar_lea.vmem %s327_s3, %s261_s22 }
   0xe   : > { %v171_v3 = vld [vmem:[%s165_s21] sm:$0xff] }
   0xf   : > { %v172_v4 = vunpack.c.l.bf16 %v171_v3  ;;  %v173_v5 = vunpack.c.h.bf16 %v171_v3 }
  0x11   : > { %185 = vperm.xlu0 %271, %v182_v2  }
  0x88   : > { %v178_v6 = vpop.permute.xlu0 %177 }
  0x89   : > { %v180_v7 = vmul.f32 %v178_v6, %v172_v4  ;;  %v181_v8 = vmul.f32 %v178_v6, %v173_v5 }
  0x8c   : > { %v186_v9 = vpop.permute.xlu0 %185 }
  0x8d   : > { %v188_v10 = vadd.f32 %v186_v9, %v180_v7  ;;  %v189_v11 = vadd.f32 %v186_v9, %v181_v8 }
  0x8f   : > { %v190_v12 = vmax.f32 %v188_v10, 0.0  ;;  %v191_v13 = vmax.f32 %v189_v11, 0.0 }
  0x91   : > { %192 = vst [vmem:[%s170_s25] sm:$0xff] %v190_v12  ;;  %193 = vst [vmem:[%s170_s25 + $0x8] sm:$0xff] %v191_v13 }
  0x92 PF: > { %s13_s12 = sadd.s32 1, %s278_s12  }
  0x93   : > { %p10_p4 = scmp.ge.s32.totalorder %s13_s12, 4  }
  0x95   :  { %12 = sbr.rel (!%p10_p4) target bundleno = 1 (0x1), region = 62 }

// kernel: double_conv.3
= control target key start
LH: loop header
LB: loop body
LE: loop exit
PB: predicated region body
PF: predicated region fallthrough
CT: control target
= control target key end

     0   :  { %s920_s18 = smov 0   ;;  %s1047_s0 = inlined_call_operand.vmem [shape: f32[2,4,256], index: 0, kind: input, shape index: {}]   ;;  %s1048_s1 = inlined_call_operand.vmem [shape: bf16[8,36], index: 1, kind: input, shape index: {}]   ;;  %s1049_s2 = inlined_call_operand.vmem [shape: f32[9,256], index: 2, kind: input, shape index: {}]   ;;  %s1050_s3 = inlined_call_operand.vmem [shape: bf16[2,8,256], index: 3, kind: output, shape index: {0}]   ;;  %s1051_s4 = inlined_call_operand.vmem [shape: f32[2,8,1], index: 4, kind: output, shape index: {1}]   ;;  %s1052_s5 = inlined_call_operand.vmem [shape: f32[2,8,1], index: 5, kind: output, shape index: {2}]  }
   0x1 LB: > { %s778_s19 = sadd.s32 4294967295, %s871_s18   ;;  %p782_p0 = scmp.ge.s32.totalorder %s871_s18, 1  ;;  %s871_s18 = sphi %s920_s18, %s16_s18  }
   0x2   : > { %p192_p1 = scmp.lt.s32.totalorder %s871_s18, 3 }
   0x4   : > { %p193_p2 = pnand %p782_p0, %p192_p1 }
   0x5   : > { %p228_p3 = scmp.lt.s32.totalorder (!%p193_p2), %s778_s19, 1  ;;  %s873_s22 = smov (!%p193_p2), 34  }
   0x6   : > { %196 = sbr.rel (%p193_p2) target bundleno = 643 (0x283), region = 32  ;;  %s874_s8 = smov (!%p193_p2), 17  }
   0x7   : > { %s875_s9 = smov (!%p193_p2), 18   ;;  %s876_s10 = smov (!%p193_p2), 33  }
   0x8   : > { %s877_s11 = smov (!%p193_p2), 32   ;;  %s878_s12 = smov (!%p193_p2), 1  }
   0x9   : > { %s879_s13 = smov (!%p193_p2), 16   ;;  %s880_s14 = smov (!%p193_p2), 2  }
   0xa   : > { %s881_s15 = smov (!%p193_p2), 94   ;;  %s882_s16 = smov (!%p193_p2), 110  }
   0xb   : > { %v789_v0 = vld [vmem:[%s1049_s2 + $0x10] ss:$0 sm:$0xff]  ;;  %v265_v1 = vlaneseq  ;;  %v790_v2 = vld [vmem:[%s1049_s2 + $0x18] ss:$0 sm:$0xff]  ;;  %s1054_s19 = smov (!%p228_p3, %s778_s19), 1  ;;  %v249_v4 = vld [vmem:[%s1049_s2 + $0x8] sm:$0xff] }
   0xc   : > { %438 = vrot.lane.b32.xlu1 %v789_v0, %s873_s22  ;;  %s937_s27 = sshll.u32 %s1054_s19, 3  ;;  %v248_v6 = vld [vmem:[%s1049_s2] sm:$0xff]  ;;  %vm258_vm0 = vcmask 138240   ;;  %vm442_vm1 = vcmask 277504   ;;  %s883_s17 = smov 111   ;;  %vm398_vm2 = vcmask 261120  }
   0xd   : > { %v266_v3 = vshrl.u32 %v265_v1, 7  ;;  %s232_s7 = scalar_lea.vmem %s1047_s0, %s937_s27  ;;  %s884_s19 = smov 95   ;;  %vm289_vm3 = vcmask 7168   ;;  %vm333_vm4 = vcmask 130048   ;;  %vm376_vm5 = vcmask 146432  }
   0xe   : > { %v247_v8 = vld [vmem:[%s232_s7] sm:$0xff]  ;;  %s885_s20 = smov 96   ;;  %vm420_vm6 = vcmask 269312   ;;  %vm311_vm7 = vcmask 15360   ;;  %s886_s21 = smov 126   ;;  %vm569_vm8 = vcmask 769024  }
   0xf   : > { %v364_v5 = vsub.s32 5, %v266_v3  ;;  %v408_v7 = vsub.s32 7, %v266_v3  ;;  %254 = vrot.lane.b32.xlu0 %v247_v8, %s874_s8  ;;  %v343_v12 = vsub.s32 4, %v266_v3  ;;  %v267_v13 = vsub.s32 0, %v266_v3  ;;  %s888_s23 = smov 112   ;;  %s237_s29 = scalar_lea.vmem %s1050_s3, %s937_s27 }
  0x10   : > { %440 = vrot.lane.b32.xlu1 %v790_v2, %s873_s22  ;;  %v253_v14 = vcombine.high %v247_v8, %v247_v8  ;;  %v386_v18 = vsub.s32 6, %v266_v3  ;;  %v277_v21 = vsub.s32 1, %v266_v3  ;;  %v321_v24 = vsub.s32 3, %v266_v3  ;;  %s887_s22 = smov 127   ;;  %s241_s7 = scalar_lea.vmem %s1051_s4, %s937_s27 }
  0x11   : > { %v369_v9 = vrot.slane %v249_v4, %v364_v5  ;;  %v365_v10 = vrot.slane %v248_v6, %v364_v5  ;;  %v413_v11 = vrot.slane %v249_v4, %v408_v7  ;;  %v268_v15 = vrot.slane %v248_v6, %v267_v13 }
  0x12   : > { %v272_v16 = vrot.slane %v249_v4, %v267_v13  ;;  %v348_v17 = vrot.slane %v249_v4, %v343_v12  ;;  %v409_v19 = vrot.slane %v248_v6, %v408_v7  ;;  %v391_v20 = vrot.slane %v249_v4, %v386_v18 }
  0x13   : > { %372 = vrot.lane.b32.xlu0 %v365_v10, %s875_s9  ;;  %v344_v22 = vrot.slane %v248_v6, %v343_v12  ;;  %v282_v23 = vrot.slane %v249_v4, %v277_v21  ;;  %v387_v25 = vrot.slane %v248_v6, %v386_v18  ;;  %v326_v26 = vrot.slane %v249_v4, %v321_v24 }
  0x14   : > { %374 = vrot.lane.b32.xlu1 %v369_v9, %s875_s9  ;;  %v299_v27 = vsub.s32 2, %v266_v3  ;;  %v278_v28 = vrot.slane %v248_v6, %v277_v21  ;;  %v322_v30 = vrot.slane %v248_v6, %v321_v24  ;;  %vm594_vm9 = vcmask 1041408  }
  0x15   : > { %vm507_vm10 = vcmask 908288   ;;  %vm538_vm11 = vcmask 785408   ;;  %vm524_vm12 = vcmask 900096   ;;  %vm493_vm13 = vcmask 916480  }
  0x16   : > { %v304_v29 = vrot.slane %v249_v4, %v299_v27  ;;  %v300_v31 = vrot.slane %v248_v6, %v299_v27  ;;  %vm476_vm14 = vcmask 1031168   ;;  %vm462_vm15 = vcmask 1039360  }
  0x17   : > { %256 = vrot.lane.b32.xlu0 %v253_v14, %s874_s8 }
  0x18   : > { %418 = vrot.lane.b32.xlu1 %v413_v11, %s876_s10 }
  0x1b   : > { %416 = vrot.lane.b32.xlu0 %v409_v19, %s876_s10  ;;  %s245_s10 = scalar_lea.vmem %s1052_s5, %s937_s27 }
  0x1c   : > { %353 = vrot.lane.b32.xlu1 %v348_v17, %s874_s8 }
  0x1f   : > { %351 = vrot.lane.b32.xlu0 %v344_v22, %s874_s8 }
  0x20   : > { %396 = vrot.lane.b32.xlu1 %v391_v20, %s877_s11 }
  0x23   : > { %394 = vrot.lane.b32.xlu0 %v387_v25, %s877_s11 }
  0x24   : > { %287 = vrot.lane.b32.xlu1 %v282_v23, %s878_s12 }
  0x27   : > { %285 = vrot.lane.b32.xlu0 %v278_v28, %s878_s12 }
  0x28   : > { %331 = vrot.lane.b32.xlu1 %v326_v26, %s879_s13 }
  0x2b   : > { %329 = vrot.lane.b32.xlu0 %v322_v30, %s879_s13 }
  0x2c   : > { %309 = vrot.lane.b32.xlu1 %v304_v29, %s880_s14 }
  0x2f   : > { %307 = vrot.lane.b32.xlu0 %v300_v31, %s880_s14 }
  0x7e   : > { %v439_v32 = vpop.permute.xlu1 %438 }
  0x81   : > { %v255_v34 = vpop.permute.xlu0 %254 }
  0x82   : > { %v441_v33 = vpop.permute.xlu1 %440  ;;  %v947_v35 = vsel %vm258_vm0, 0.0, %v255_v34 }
  0x83   : > { %v952_v37 = vmul.f32 %v268_v15, %v947_v35  ;;  %v443_v55 = vsel %vm442_vm1, %v439_v32, %v441_v33  ;;  %v447_v60 = vmul.f32 %v439_v32, %v947_v35  ;;  %vm574_vm1 = vcmask 1043456  }
  0x85   : > { %v373_v38 = vpop.permute.xlu0 %372 }
  0x86   : > { %v949_v36 = vpop.permute.xlu1 %374  ;;  %v381_v43 = vmul.f32 %v373_v38, %v947_v35 }
  0x87   : > { %v377_v9 = vsel %vm376_vm5, %v373_v38, %v949_v36 }
  0x88   : > { %v515_v48 = vrot.slane %v381_v43, 4 }
  0x89   : > { %v257_v40 = vpop.permute.xlu0 %256 }
  0x8a   : > { %v954_v39 = vpop.permute.xlu1 %418  ;;  %v957_v41 = vsel %vm258_vm0, %v255_v34, %v257_v40  ;;  %v960_v42 = vsel %vm258_vm0, %v257_v40, 0.0 }
  0x8b   : > { %v449_v45 = vmul.f32 %v441_v33, %v960_v42  ;;  %v965_v46 = vmul.f32 %v272_v16, %v957_v41  ;;  %v448_v58 = vmul.f32 %v443_v55, %v957_v41  ;;  %v382_v15 = vmul.f32 %v377_v9, %v957_v41 }
  0x8c   : > { %v383_v16 = vmul.f32 %v949_v36, %v960_v42  ;;  %v427_v31 = vmul.f32 %v954_v39, %v960_v42 }
  0x8d   : > { %567 = vrot.lane.b32.xlu1 %v449_v45, %s881_s15  ;;  %v417_v47 = vpop.permute.xlu0 %416  ;;  %v824_v0 = vpack.i.bf16 %v448_v58, %v447_v60  ;;  %v516_v27 = vrot.slane %v382_v15, 4 }
  0x8e   : > { %v354_v44 = vpop.permute.xlu1 %353  ;;  %v425_v49 = vmul.f32 %v417_v47, %v947_v35  ;;  %v421_v13 = vsel %vm420_vm6, %v417_v47, %v954_v39  ;;  %v517_v28 = vrot.slane %v383_v16, 4  ;;  %v548_v38 = vrot.slane %v427_v31, 4 }
  0x8f   : > { %v361_v3 = vmul.f32 %v354_v44, %v960_v42  ;;  %v426_v25 = vmul.f32 %v421_v13, %v957_v41 }
  0x90   : > { %v546_v53 = vrot.slane %v425_v49, 4  ;;  %v844_v34 = vpack.i.bf16 %v517_v28, %v516_v27 }
  0x91   : > { %518 = vrot.lane.b32.xlu1 %v515_v48, %s882_s16  ;;  %v352_v51 = vpop.permute.xlu0 %351  ;;  %v547_v33 = vrot.slane %v426_v25, 4 }
  0x92   : > { %v397_v50 = vpop.permute.xlu1 %396  ;;  %v359_v52 = vmul.f32 %v352_v51, %v947_v35  ;;  %v355_v59 = vsel %vm258_vm0, %v352_v51, %v354_v44  ;;  %v889_v44 = vmov 0   ;;  %vm555_vm0 = vcmask 777216  }
  0x93   : > { %v360_v62 = vmul.f32 %v355_v59, %v957_v41  ;;  %v405_v10 = vmul.f32 %v397_v50, %v960_v42  ;;  %633 = vmatprep.mubr.bf16.mxu0 %v889_v44 }
  0x94   : > { %501 = vrot.lane.b32.xlu0 %v359_v52, %s883_s17 }
  0x95   : > { %549 = vrot.lane.b32.xlu1 %v546_v53, %s884_s19  ;;  %v395_v56 = vpop.permute.xlu0 %394  ;;  %v829_v7 = vpack.i.bf16 %v361_v3, %v360_v62 }
  0x96   : > { %v288_v54 = vpop.permute.xlu1 %287  ;;  %v403_v57 = vmul.f32 %v395_v56, %v947_v35  ;;  %v399_v1 = vsel %vm398_vm2, %v395_v56, %v397_v50  ;;  %vm590_vm2 = vcmask 293888  }
  0x97   : > { %v404_v5 = vmul.f32 %v399_v1, %v957_v41  ;;  %v296_v11 = vmul.f32 %v288_v54, %v960_v42 }
  0x98   : > { %532 = vrot.lane.b32.xlu0 %v403_v57, %s885_s20 }
  0x99   : > { %v286_v61 = vpop.permute.xlu0 %285  ;;  %v834_v20 = vpack.i.bf16 %v405_v10, %v404_v5  ;;  %v455_v23 = vrot.slane %v296_v11, 4 }
  0x9a   : > { %v332_v63 = vpop.permute.xlu1 %331  ;;  %v290_v2 = vsel %vm289_vm3, %v286_v61, %v288_v54  ;;  %v294_v40 = vmul.f32 %v286_v61, %v947_v35 }
  0x9b   : > { %v295_v6 = vmul.f32 %v290_v2, %v957_v41  ;;  %v340_v24 = vmul.f32 %v332_v63, %v960_v42 }
  0x9c   : > { %825 = vrot.lane.b32.xlu0 %v824_v0, %s881_s15  ;;  %v453_v39 = vrot.slane %v294_v40, 4 }
  0x9d   : > { %v330_v4 = vpop.permute.xlu0 %329  ;;  %v454_v17 = vrot.slane %v295_v6, 4  ;;  %v486_v32 = vrot.slane %v340_v24, 4 }
  0x9e   : > { %v334_v8 = vsel %vm333_vm4, %v330_v4, %v332_v63  ;;  %v310_v12 = vpop.permute.xlu1 %309 }
  0x9f   : > { %v339_v18 = vmul.f32 %v334_v8, %v957_v41  ;;  %v318_v21 = vmul.f32 %v310_v12, %v960_v42  ;;  %v854_v30 = vpack.i.bf16 %v455_v23, %v454_v17  ;;  %v338_v42 = vmul.f32 %v330_v4, %v947_v35 }
  0xa0   : > { %830 = vrot.lane.b32.xlu0 %v829_v7, %s883_s17 }
  0xa1   : > { %v308_v14 = vpop.permute.xlu0 %307  ;;  %v485_v29 = vrot.slane %v339_v18, 4  ;;  %v484_v45 = vrot.slane %v338_v42, 4 }
  0xa2   : > { %v312_v19 = vsel %vm311_vm7, %v308_v14, %v310_v12  ;;  %v316_v43 = vmul.f32 %v308_v14, %v947_v35 }
  0xa3   : > { %v317_v22 = vmul.f32 %v312_v19, %v957_v41  ;;  %v859_v36 = vpack.i.bf16 %v486_v32, %v485_v29  ;;  %v849_v41 = vpack.i.bf16 %v548_v38, %v547_v33 }
  0xa4   : > { %835 = vrot.lane.b32.xlu0 %v834_v20, %s885_s20 }
  0xa5   : > { %v839_v26 = vpack.i.bf16 %v318_v21, %v317_v22 }
  0xa7   : > { %840 = vrot.lane.b32.xlu1 %v839_v26, %s886_s21 }
  0xa8   : > { %855 = vrot.lane.b32.xlu0 %v854_v30, %s887_s22 }
  0xab   : > { %845 = vrot.lane.b32.xlu1 %v844_v34, %s882_s16 }
  0xac   : > { %860 = vrot.lane.b32.xlu0 %v859_v36, %s888_s23 }
  0xaf   : > { %850 = vrot.lane.b32.xlu1 %v849_v41, %s884_s19 }
  0xb0   : > { %470 = vrot.lane.b32.xlu0 %v316_v43, %s886_s21 }
  0xb3   : > { %456 = vrot.lane.b32.xlu1 %v453_v39, %s887_s22 }
  0xb7   : > { %487 = vrot.lane.b32.xlu1 %v484_v45, %s888_s23 }
  0xff   : > { %v568_v48 = vpop.permute.xlu1 %567 }
 0x103   : > { %v519_v51 = vpop.permute.xlu1 %518 }
 0x106   : > { %v502_v47 = vpop.permute.xlu0 %501 }
 0x107   : > { %v550_v35 = vpop.permute.xlu1 %549 }
 0x10a   : > { %v533_v49 = vpop.permute.xlu0 %532 }
 0x10e   : > { %v826_v50 = vpop.permute.xlu0 %825 }
 0x10f   : > { %v828_v52 = vunpack.i.h.bf16 %v826_v50  ;;  %v827_v53 = vunpack.i.l.bf16 %v826_v50 }
 0x111   : > { %v571_v54 = vsel %vm569_vm8, %v828_v52, %v568_v48  ;;  %v570_v55 = vsel %vm569_vm8, %v827_v53, %v828_v52 }
 0x112   : > { %v831_v56 = vpop.permute.xlu0 %830  ;;  %v589_v57 = vpack.c.bf16 %v571_v54, %v571_v54  ;;  %v588_v58 = vpack.c.bf16 %v570_v55, %v570_v55 }
 0x113   : > { %v833_v63 = vunpack.i.h.bf16 %v831_v56  ;;  %v832_v0 = vunpack.i.l.bf16 %v831_v56 }
 0x114   : > { %791 = vmatprep.subr.msk.bf16.mxu0 %vm594_vm9, %v589_v57  ;;  %v596_v59 = vsel %vm594_vm9, %v588_v58, 0 }
 0x115   : > { %612 = vmatpush1.bf16.msra.mxu0 %v596_v59  ;;  %v508_v13 = vsel %vm507_vm10, %v502_v47, %v832_v0  ;;  %v509_v20 = vsel %vm507_vm10, %v832_v0, %v833_v63 }
 0x116   : > { %v836_v60 = vpop.permute.xlu0 %835 }
 0x117   : > { %v838_v2 = vunpack.i.h.bf16 %v836_v60  ;;  %v837_v3 = vunpack.i.l.bf16 %v836_v60 }
 0x119   : > { %v841_v61 = vpop.permute.xlu1 %840  ;;  %v539_v21 = vsel %vm538_vm11, %v533_v49, %v837_v3  ;;  %v540_v22 = vsel %vm538_vm11, %v837_v3, %v838_v2 }
 0x11a   : > { %v856_v62 = vpop.permute.xlu0 %855  ;;  %v843_v7 = vunpack.i.h.bf16 %v841_v61  ;;  %v842_v8 = vunpack.i.l.bf16 %v841_v61 }
 0x11b   : > { %v858_v11 = vunpack.i.h.bf16 %v856_v62  ;;  %v857_v12 = vunpack.i.l.bf16 %v856_v62 }
 0x11c   : > { %v478_v23 = vsel %vm476_vm14, %v842_v8, %v843_v7 }
 0x11d   : > { %v846_v1 = vpop.permute.xlu1 %845  ;;  %v464_v26 = vsel %vm462_vm15, %v857_v12, %v858_v11 }
 0x11e   : > { %v848_v4 = vunpack.i.h.bf16 %v846_v1  ;;  %v847_v5 = vunpack.i.l.bf16 %v846_v1  ;;  %v861_v6 = vpop.permute.xlu0 %860  ;;  %v576_v38 = vsel %vm574_vm1, %v965_v46, %v464_v26  ;;  %v583_v46 = vld [vmem:[%s1048_s1] sm:$0xf] }
 0x11f   : > { %v863_v9 = vunpack.i.h.bf16 %v861_v6  ;;  %v862_v10 = vunpack.i.l.bf16 %v861_v6 }
 0x120   : > { %v526_v14 = vsel %vm524_vm12, %v847_v5, %v848_v4  ;;  %v525_v16 = vsel %vm524_vm12, %v519_v51, %v847_v5 }
 0x121   : > { %v851_v15 = vpop.permute.xlu1 %850  ;;  %v495_v19 = vsel %vm493_vm13, %v862_v10, %v863_v9  ;;  %v580_v27 = vsel %vm574_vm1, %v509_v20, %v526_v14  ;;  %v579_v30 = vsel %vm574_vm1, %v508_v13, %v525_v16 }
 0x122   : > { %v853_v17 = vunpack.i.h.bf16 %v851_v15  ;;  %v852_v18 = vunpack.i.l.bf16 %v851_v15  ;;  %v578_v32 = vsel %vm574_vm1, %v478_v23, %v495_v19  ;;  %v471_v36 = vpop.permute.xlu0 %470 }
 0x123   : > { %v585_v41 = vpack.c.bf16 %v578_v32, %v576_v38  ;;  %v477_v44 = vsel %vm476_vm14, %v471_v36, %v842_v8 }
 0x124   : > { %v556_v24 = vsel %vm555_vm0, %v550_v35, %v852_v18  ;;  %v557_v25 = vsel %vm555_vm0, %v852_v18, %v853_v17 }
 0x125   : > { %v457_v28 = vpop.permute.xlu1 %456  ;;  %v582_v29 = vsel %vm574_vm1, %v540_v22, %v557_v25  ;;  %v581_v31 = vsel %vm574_vm1, %v539_v21, %v556_v24 }
 0x126   : > { %v587_v33 = vpack.c.bf16 %v582_v29, %v580_v27  ;;  %v586_v34 = vpack.c.bf16 %v581_v31, %v579_v30  ;;  %v463_v40 = vsel %vm462_vm15, %v457_v28, %v857_v12 }
 0x127   : > { %v575_v42 = vsel %vm574_vm1, %v952_v37, %v463_v40 }
 0x128   : > { %613 = vmatprep.subr.bf16.mxu0 %v587_v33 }
 0x129   : > { %v488_v43 = vpop.permute.xlu1 %487  ;;  %614 = vmatpush1.bf16.msra.mxu0 %v586_v34 }
 0x12a   : > { %v494_v39 = vsel %vm493_vm13, %v488_v43, %v862_v10  ;;  %615 = vmatprep.subr.bf16.mxu0 %v585_v41 }
 0x12b   : > { %v577_v45 = vsel %vm574_vm1, %v477_v44, %v494_v39 }
 0x12c   : > { %v584_v47 = vpack.c.bf16 %v577_v45, %v575_v42 }
 0x12e   : > { %616 = vmatpush1.bf16.msra.mxu0 %v584_v47 }
 0x131   : > { %792 = vmatmul.mubr.msk.bf16.vlgmr.msra.gmra.mxu0 %vm590_vm2, %v583_v46 }
 0x1f1   : > { %v635_v48 = vpop.f32.mrf.mxu0 }
 0x1f2   : > { %v655_v51 = vmul.f32 %v635_v48, %v635_v48 }
 0x1f3   : > { %v637_v49 = vpop.f32.mrf.mxu0 }
 0x1f4   : > { %v798_v50 = vpack.c.bf16 %v637_v49, %v635_v48  ;;  %v651_v37 = vadd.f32 %v637_v49, %v635_v48  ;;  %v656_v52 = vmul.f32 %v637_v49, %v637_v49 }
 0x1f5   : > { %v639_v53 = vpop.f32.mrf.mxu0 }
 0x1f6   : > { %650 = vst [vmem:[%s237_s29] sm:$0xff] %v798_v50  ;;  %652 = vadd.xlane.f32.xlu0 %v651_v37  ;;  %v657_v54 = vadd.f32 %v656_v52, %v655_v51 }
 0x1f7   : > { %v640_v55 = vpop.f32.mrf.mxu0 }
 0x1f8   : > { %658 = vadd.xlane.f32.xlu1 %v657_v54 }
 0x27f   : > { %v653_v56 = vpop.xlane.xlu0 %652 }
 0x280   : > { %654 = vst.msk [vmem:[%s241_s7] sm:$0xff] %vm289_vm3, %v653_v56 }
 0x281   : > { %v659_v57 = vpop.xlane.xlu1 %658 }
 0x282   : > { %660 = vst.msk [vmem:[%s245_s10] sm:$0xff] %vm289_vm3, %v659_v57 }
 0x283 PF: > { %s16_s18 = sadd.s32 1, %s871_s18  }
 0x284   : > { %p13_p4 = scmp.ge.s32.totalorder %s16_s18, 4  }
 0x286   :  { %15 = sbr.rel (!%p13_p4) target bundleno = 1 (0x1), region = 86 }

// kernel: double_conv.4
= control target key start
LH: loop header
LB: loop body
LE: loop exit
PB: predicated region body
PF: predicated region fallthrough
CT: control target
= control target key end

     0   :  { %s987_s24 = smov 0   ;;  %s1120_s0 = inlined_call_operand.vmem [shape: bf16[2,8,256], index: 0, kind: input, shape index: {}]   ;;  %s1121_s1 = inlined_call_operand.vmem [shape: f32[8,1], index: 1, kind: input, shape index: {}]   ;;  %s1122_s2 = inlined_call_operand.vmem [shape: f32[8,1], index: 2, kind: input, shape index: {}]   ;;  %s1123_s3 = inlined_call_operand.vmem [shape: bf16[8,72], index: 3, kind: input, shape index: {}]   ;;  %s1124_s4 = inlined_call_operand.vmem [shape: f32[9,256], index: 4, kind: input, shape index: {}]   ;;  %s1125_s5 = inlined_call_operand.vmem [shape: bf16[2,8,256], index: 5, kind: output, shape index: {0}]   ;;  %s1126_s6 = inlined_call_operand.vmem [shape: f32[2,8,1], index: 6, kind: output, shape index: {1}]   ;;  %s1127_s7 = inlined_call_operand.vmem [shape: f32[2,8,1], index: 7, kind: output, shape index: {2}]  }
   0x1 LB: > { %s835_s25 = sadd.s32 4294967295, %s928_s24   ;;  %p839_p0 = scmp.ge.s32.totalorder %s928_s24, 1  ;;  %s928_s24 = sphi %s987_s24, %s18_s24  }
   0x2   : > { %p242_p1 = scmp.lt.s32.totalorder %s928_s24, 3 }
   0x4   : > { %p243_p2 = pnand %p839_p0, %p242_p1 }
   0x5   : > { %s931_s30 = smov (!%p243_p2), 34   ;;  %s932_s16 = smov (!%p243_p2), 32  }
   0x6   : > { %246 = sbr.rel (%p243_p2) target bundleno = 759 (0x2f7), region = 40  ;;  %s933_s17 = smov (!%p243_p2), 33  }
   0x7   : > { %s934_s18 = smov (!%p243_p2), 17   ;;  %s935_s19 = smov (!%p243_p2), 18  }
   0x8   : > { %s936_s20 = smov (!%p243_p2), 2   ;;  %s937_s21 = smov (!%p243_p2), 16  }
   0x9   : > { %s938_s22 = smov (!%p243_p2), 1   ;;  %p282_p3 = scmp.lt.s32.totalorder (!%p243_p2), %s835_s25, 1 }
   0xa   : > { %s940_s29 = smov (!%p243_p2), 95   ;;  %s942_s8 = smov (!%p243_p2), 110  }
   0xb   : > { %v304_v0 = vld [vmem:[%s1121_s1] sm:$0xff]  ;;  %v339_v1 = vlaneseq  ;;  %v930_v2 = vmov 0   ;;  %v847_v3 = vld [vmem:[%s1124_s4 + $0x18] ss:$0 sm:$0xff]  ;;  %v1009_v6 = vld [vmem:[%s1124_s4 + $0x8] sm:$0xff]  ;;  %s1129_s25 = smov (!%p282_p3, %s835_s25), 1 }
   0xc   : > { %881 = vset.pattern.permute.xlu0 %v930_v2  ;;  %690 = vmatprep.mubr.bf16.mxu0 %v930_v2  ;;  %v312_v5 = vld [vmem:[%s1122_s2] sm:$0xff]  ;;  %v846_v10 = vld [vmem:[%s1124_s4 + $0x10] ss:$0 sm:$0xff]  ;;  %s1043_s23 = sshll.u32 %s1129_s25, 3  ;;  %vm516_vm0 = vcmask 277504   ;;  %vm332_vm1 = vcmask 138240  }
   0xd   : > { %307 = vperm.xlu0 %881, %v304_v0   ;;  %v1001_v4 = vshrl.u32 %v339_v1, 7  ;;  %514 = vrot.lane.b32.xlu1 %v847_v3, %s931_s30  ;;  %v1020_v11 = vld [vmem:[%s1124_s4] sm:$0xff]  ;;  %s286_s28 = scalar_lea.vmem %s1120_s0, %s1043_s23  ;;  %vm494_vm2 = vcmask 269312   ;;  %vm472_vm3 = vcmask 261120   ;;  %s939_s25 = smov 94   ;;  %vm450_vm4 = vcmask 146432  }
   0xe   : > { %v301_v26 = vld [vmem:[%s286_s28] sm:$0xff]  ;;  %vm407_vm5 = vcmask 130048   ;;  %vm385_vm6 = vcmask 15360   ;;  %s943_s9 = smov 111   ;;  %vm363_vm7 = vcmask 7168   ;;  %s944_s10 = smov 112  }
   0xf   : > { %v460_v7 = vsub.s32 6, %v1001_v4  ;;  %v482_v8 = vsub.s32 7, %v1001_v4  ;;  %v417_v14 = vsub.s32 4, %v1001_v4  ;;  %v438_v18 = vsub.s32 5, %v1001_v4  ;;  %s945_s11 = smov 126   ;;  %s946_s12 = smov 127  }
  0x10   : > { %v373_v20 = vsub.s32 2, %v1001_v4  ;;  %v395_v22 = vsub.s32 3, %v1001_v4  ;;  %v351_v24 = vsub.s32 1, %v1001_v4  ;;  %v302_v27 = vunpack.c.l.bf16 %v301_v26  ;;  %s299_s26 = scalar_lea.vmem %s1127_s7, %s1043_s23 }
  0x11   : > { %315 = vperm.xlu0 %881, %v312_v5   ;;  %v465_v9 = vrot.slane %v1009_v6, %v460_v7  ;;  %v487_v12 = vrot.slane %v1009_v6, %v482_v8  ;;  %v461_v13 = vrot.slane %v1020_v11, %v460_v7  ;;  %v422_v15 = vrot.slane %v1009_v6, %v417_v14 }
  0x12   : > { %v483_v16 = vrot.slane %v1020_v11, %v482_v8  ;;  %v418_v17 = vrot.slane %v1020_v11, %v417_v14  ;;  %v439_v19 = vrot.slane %v1020_v11, %v438_v18  ;;  %v374_v21 = vrot.slane %v1020_v11, %v373_v20 }
  0x13   : > { %470 = vrot.lane.b32.xlu1 %v465_v9, %s932_s16  ;;  %v396_v23 = vrot.slane %v1020_v11, %v395_v22  ;;  %v352_v25 = vrot.slane %v1020_v11, %v351_v24  ;;  %v303_v29 = vunpack.c.h.bf16 %v301_v26  ;;  %v443_v37 = vrot.slane %v1009_v6, %v438_v18 }
  0x14   : > { %v378_v38 = vrot.slane %v1009_v6, %v373_v20  ;;  %v400_v39 = vrot.slane %v1009_v6, %v395_v22  ;;  %v356_v40 = vrot.slane %v1009_v6, %v351_v24  ;;  %vm631_vm8 = vcmask 769024  }
  0x15   : > { %512 = vrot.lane.b32.xlu0 %v846_v10, %s931_s30  ;;  %s941_s30 = smov 96   ;;  %vm651_vm9 = vcmask 1043456   ;;  %vm617_vm10 = vcmask 777216   ;;  %vm603_vm11 = vcmask 785408   ;;  %vm589_vm12 = vcmask 900096  }
  0x16   : > { %vm575_vm13 = vcmask 908288   ;;  %vm561_vm14 = vcmask 916480   ;;  %vm547_vm15 = vcmask 1031168  }
  0x17   : > { %492 = vrot.lane.b32.xlu1 %v487_v12, %s933_s17 }
  0x19   : > { %468 = vrot.lane.b32.xlu0 %v461_v13, %s932_s16 }
  0x1b   : > { %427 = vrot.lane.b32.xlu1 %v422_v15, %s934_s18 }
  0x1d   : > { %490 = vrot.lane.b32.xlu0 %v483_v16, %s933_s17  ;;  %s291_s17 = scalar_lea.vmem %s1125_s5, %s1043_s23 }
  0x21   : > { %425 = vrot.lane.b32.xlu0 %v418_v17, %s934_s18 }
  0x25   : > { %446 = vrot.lane.b32.xlu0 %v439_v19, %s935_s19 }
  0x29   : > { %381 = vrot.lane.b32.xlu0 %v374_v21, %s936_s20 }
  0x2d   : > { %403 = vrot.lane.b32.xlu0 %v396_v23, %s937_s21 }
  0x31   : > { %359 = vrot.lane.b32.xlu0 %v352_v25, %s938_s22 }
  0x7f   : > { %v515_v41 = vpop.permute.xlu1 %514 }
  0x85   : > { %v471_v43 = vpop.permute.xlu1 %470 }
  0x88   : > { %v308_v28 = vpop.permute.xlu0 %307 }
  0x89   : > { %v310_v30 = vmul.f32 %v308_v28, %v302_v27  ;;  %v311_v32 = vmul.f32 %v308_v28, %v303_v29  ;;  %v493_v45 = vpop.permute.xlu1 %492 }
  0x8c   : > { %v316_v31 = vpop.permute.xlu0 %315 }
  0x8d   : > { %v318_v33 = vadd.f32 %v316_v31, %v310_v30  ;;  %v319_v34 = vadd.f32 %v316_v31, %v311_v32  ;;  %v428_v47 = vpop.permute.xlu1 %427 }
  0x8f   : > { %v320_v35 = vmax.f32 %v318_v33, 0.0  ;;  %v321_v36 = vmax.f32 %v319_v34, 0.0 }
  0x90   : > { %v513_v42 = vpop.permute.xlu0 %512 }
  0x91   : > { %328 = vrot.lane.b32.xlu1 %v320_v35, %s934_s18  ;;  %v517_v51 = vsel %vm516_vm0, %v513_v42, %v515_v41  ;;  %vm533_vm0 = vcmask 1039360  }
  0x94   : > { %v469_v44 = vpop.permute.xlu0 %468 }
  0x95   : > { %330 = vrot.lane.b32.xlu1 %v321_v36, %s934_s18  ;;  %v473_v62 = vsel %vm472_vm3, %v469_v44, %v471_v43 }
  0x98   : > { %v491_v46 = vpop.permute.xlu0 %490 }
  0x99   : > { %448 = vrot.lane.b32.xlu1 %v443_v37, %s935_s19  ;;  %v495_v53 = vsel %vm494_vm2, %v491_v46, %v493_v45 }
  0x9c   : > { %v1056_v48 = vpop.permute.xlu0 %425 }
  0x9d   : > { %383 = vrot.lane.b32.xlu1 %v378_v38, %s936_s20  ;;  %v429_v14 = vsel %vm332_vm1, %v1056_v48, %v428_v47  ;;  %s295_s20 = scalar_lea.vmem %s1126_s6, %s1043_s23 }
  0xa0   : > { %v447_v57 = vpop.permute.xlu0 %446 }
  0xa1   : > { %405 = vrot.lane.b32.xlu1 %v400_v39, %s937_s21 }
  0xa4   : > { %v382_v7 = vpop.permute.xlu0 %381 }
  0xa5   : > { %361 = vrot.lane.b32.xlu1 %v356_v40, %s938_s22 }
  0xa8   : > { %v404_v19 = vpop.permute.xlu0 %403 }
  0xac   : > { %v360_v32 = vpop.permute.xlu0 %359 }
 0x103   : > { %v329_v49 = vpop.permute.xlu1 %328 }
 0x104   : > { %v1059_v50 = vsel %vm332_vm1, 0.0, %v329_v49 }
 0x105   : > { %v521_v56 = vmul.f32 %v513_v42, %v1059_v50  ;;  %v499_v13 = vmul.f32 %v491_v46, %v1059_v50  ;;  %v477_v16 = vmul.f32 %v469_v44, %v1059_v50  ;;  %v455_v26 = vmul.f32 %v447_v57, %v1059_v50 }
 0x106   : > { %v433_v29 = vmul.f32 %v1056_v48, %v1059_v50  ;;  %v412_v35 = vmul.f32 %v404_v19, %v1059_v50  ;;  %v390_v38 = vmul.f32 %v382_v7, %v1059_v50  ;;  %v368_v39 = vmul.f32 %v360_v32, %v1059_v50 }
 0x107   : > { %v331_v52 = vpop.permute.xlu1 %330 }
 0x108   : > { %v1062_v54 = vsel %vm332_vm1, %v329_v49, %v331_v52  ;;  %v1065_v55 = vsel %vm332_vm1, %v331_v52, 0.0  ;;  %vm647_vm1 = vcmask 588800  }
 0x109   : > { %v523_v58 = vmul.f32 %v515_v41, %v1065_v55  ;;  %v522_v59 = vmul.f32 %v517_v51, %v1062_v54  ;;  %v500_v60 = vmul.f32 %v495_v53, %v1062_v54  ;;  %v501_v61 = vmul.f32 %v493_v45, %v1065_v55 }
 0x10a   : > { %v478_v1 = vmul.f32 %v473_v62, %v1062_v54  ;;  %v479_v2 = vmul.f32 %v471_v43, %v1065_v55  ;;  %v434_v17 = vmul.f32 %v429_v14, %v1062_v54  ;;  %v435_v18 = vmul.f32 %v428_v47, %v1065_v55 }
 0x10b   : > { %629 = vrot.lane.b32.xlu1 %v523_v58, %s939_s25  ;;  %v449_v63 = vpop.permute.xlu1 %448  ;;  %v882_v0 = vpack.i.bf16 %v522_v59, %v521_v56  ;;  %v892_v3 = vpack.i.bf16 %v501_v61, %v500_v60 }
 0x10c   : > { %v451_v5 = vsel %vm450_vm4, %v447_v57, %v449_v63  ;;  %v887_v9 = vpack.i.bf16 %v479_v2, %v478_v1  ;;  %v457_v12 = vmul.f32 %v449_v63, %v1065_v55  ;;  %v897_v22 = vpack.i.bf16 %v435_v18, %v434_v17 }
 0x10d   : > { %883 = vrot.lane.b32.xlu0 %v882_v0, %s939_s25  ;;  %v456_v10 = vmul.f32 %v451_v5, %v1062_v54 }
 0x10f   : > { %893 = vrot.lane.b32.xlu1 %v892_v3, %s940_s29  ;;  %v384_v8 = vpop.permute.xlu1 %383  ;;  %v902_v20 = vpack.i.bf16 %v457_v12, %v456_v10 }
 0x110   : > { %v386_v23 = vsel %vm385_vm6, %v382_v7, %v384_v8  ;;  %v392_v28 = vmul.f32 %v384_v8, %v1065_v55 }
 0x111   : > { %888 = vrot.lane.b32.xlu0 %v887_v9, %s941_s30  ;;  %v391_v27 = vmul.f32 %v386_v23, %v1062_v54 }
 0x113   : > { %611 = vrot.lane.b32.xlu1 %v499_v13, %s940_s29  ;;  %v406_v15 = vpop.permute.xlu1 %405  ;;  %v907_v33 = vpack.i.bf16 %v392_v28, %v391_v27 }
 0x114   : > { %v408_v21 = vsel %vm407_vm5, %v404_v19, %v406_v15  ;;  %v414_v25 = vmul.f32 %v406_v15, %v1065_v55 }
 0x115   : > { %597 = vrot.lane.b32.xlu0 %v477_v16, %s941_s30  ;;  %v413_v24 = vmul.f32 %v408_v21, %v1062_v54 }
 0x117   : > { %903 = vrot.lane.b32.xlu1 %v902_v20, %s942_s8  ;;  %v912_v30 = vpack.i.bf16 %v414_v25, %v413_v24  ;;  %v362_v31 = vpop.permute.xlu1 %361 }
 0x118   : > { %v364_v34 = vsel %vm363_vm7, %v360_v32, %v362_v31  ;;  %v370_v37 = vmul.f32 %v362_v31, %v1065_v55 }
 0x119   : > { %898 = vrot.lane.b32.xlu0 %v897_v22, %s943_s9  ;;  %v369_v36 = vmul.f32 %v364_v34, %v1062_v54 }
 0x11b   : > { %583 = vrot.lane.b32.xlu1 %v455_v26, %s942_s8  ;;  %v917_v40 = vpack.i.bf16 %v370_v37, %v369_v36  ;;  %v341_v26 = vsub.s32 0, %v1001_v4 }
 0x11d   : > { %569 = vrot.lane.b32.xlu0 %v433_v29, %s943_s9  ;;  %v346_v34 = vrot.slane %v1009_v6, %v341_v26  ;;  %v636_v6 = vld [vmem:[%s1123_s3] sm:$0xf] }
 0x11f   : > { %913 = vrot.lane.b32.xlu1 %v912_v30, %s944_s10  ;;  %v348_v4 = vmul.f32 %v346_v34, %v1062_v54 }
 0x121   : > { %908 = vrot.lane.b32.xlu0 %v907_v33, %s945_s11 }
 0x123   : > { %555 = vrot.lane.b32.xlu1 %v412_v35, %s944_s10  ;;  %v342_v35 = vrot.slane %v1020_v11, %v341_v26 }
 0x125   : > { %541 = vrot.lane.b32.xlu0 %v390_v38, %s945_s11 }
 0x127   : > { %527 = vrot.lane.b32.xlu1 %v368_v39, %s946_s12 }
 0x129   : > { %918 = vrot.lane.b32.xlu0 %v917_v40, %s946_s12  ;;  %v347_v40 = vmul.f32 %v342_v35, %v1059_v50 }
 0x17d   : > { %v630_v41 = vpop.permute.xlu1 %629 }
 0x17f   : > { %v884_v42 = vpop.permute.xlu0 %883 }
 0x180   : > { %v886_v43 = vunpack.i.h.bf16 %v884_v42  ;;  %v885_v44 = vunpack.i.l.bf16 %v884_v42 }
 0x181   : > { %v894_v45 = vpop.permute.xlu1 %893 }
 0x182   : > { %v896_v46 = vunpack.i.h.bf16 %v894_v45  ;;  %v895_v47 = vunpack.i.l.bf16 %v894_v45  ;;  %v633_v48 = vsel %vm631_vm8, %v886_v43, %v630_v41  ;;  %v632_v49 = vsel %vm631_vm8, %v885_v44, %v886_v43 }
 0x183   : > { %v889_v51 = vpop.permute.xlu0 %888  ;;  %v646_v52 = vpack.c.bf16 %v633_v48, %v633_v48  ;;  %v645_v53 = vpack.c.bf16 %v632_v49, %v632_v49 }
 0x184   : > { %v891_v55 = vunpack.i.h.bf16 %v889_v51  ;;  %v890_v56 = vunpack.i.l.bf16 %v889_v51  ;;  %v619_v60 = vsel %vm617_vm10, %v895_v47, %v896_v46 }
 0x185   : > { %848 = vmatprep.subr.msk.bf16.mxu0 %vm651_vm9, %v646_v52  ;;  %v612_v57 = vpop.permute.xlu1 %611  ;;  %v653_v58 = vsel %vm651_vm9, %v645_v53, 0 }
 0x186   : > { %665 = vmatpush1.bf16.msra.mxu0 %v653_v58  ;;  %v605_v59 = vsel %vm603_vm11, %v890_v56, %v891_v55  ;;  %v618_v63 = vsel %vm617_vm10, %v612_v57, %v895_v47 }
 0x187   : > { %v598_v61 = vpop.permute.xlu0 %597  ;;  %v644_v62 = vpack.c.bf16 %v619_v60, %v605_v59 }
 0x188   : > { %v604_v0 = vsel %vm603_vm11, %v598_v61, %v890_v56 }
 0x189   : > { %v643_v1 = vpack.c.bf16 %v618_v63, %v604_v0  ;;  %v904_v2 = vpop.permute.xlu1 %903  ;;  %666 = vmatprep.subr.bf16.mxu0 %v644_v62 }
 0x18a   : > { %v906_v3 = vunpack.i.h.bf16 %v904_v2  ;;  %v905_v5 = vunpack.i.l.bf16 %v904_v2 }
 0x18b   : > { %v899_v7 = vpop.permute.xlu0 %898  ;;  %667 = vmatpush1.bf16.msra.mxu0 %v643_v1 }
 0x18c   : > { %v901_v8 = vunpack.i.h.bf16 %v899_v7  ;;  %v900_v9 = vunpack.i.l.bf16 %v899_v7  ;;  %v591_v13 = vsel %vm589_vm12, %v905_v5, %v906_v3 }
 0x18d   : > { %v584_v10 = vpop.permute.xlu1 %583 }
 0x18e   : > { %v577_v12 = vsel %vm575_vm13, %v900_v9, %v901_v8  ;;  %v590_v16 = vsel %vm589_vm12, %v584_v10, %v905_v5 }
 0x18f   : > { %v570_v14 = vpop.permute.xlu0 %569  ;;  %v642_v15 = vpack.c.bf16 %v591_v13, %v577_v12 }
 0x190   : > { %v576_v17 = vsel %vm575_vm13, %v570_v14, %v900_v9 }
 0x191   : > { %v641_v18 = vpack.c.bf16 %v590_v16, %v576_v17  ;;  %v914_v19 = vpop.permute.xlu1 %913  ;;  %668 = vmatprep.subr.bf16.mxu0 %v642_v15 }
 0x192   : > { %v916_v20 = vunpack.i.h.bf16 %v914_v19  ;;  %v915_v21 = vunpack.i.l.bf16 %v914_v19 }
 0x193   : > { %v909_v22 = vpop.permute.xlu0 %908  ;;  %669 = vmatpush1.bf16.msra.mxu0 %v641_v18 }
 0x194   : > { %v911_v23 = vunpack.i.h.bf16 %v909_v22  ;;  %v910_v24 = vunpack.i.l.bf16 %v909_v22  ;;  %v563_v28 = vsel %vm561_vm14, %v915_v21, %v916_v20 }
 0x195   : > { %v556_v25 = vpop.permute.xlu1 %555 }
 0x196   : > { %v549_v27 = vsel %vm547_vm15, %v910_v24, %v911_v23  ;;  %v562_v31 = vsel %vm561_vm14, %v556_v25, %v915_v21 }
 0x197   : > { %v542_v29 = vpop.permute.xlu0 %541  ;;  %v640_v30 = vpack.c.bf16 %v563_v28, %v549_v27 }
 0x198   : > { %v548_v32 = vsel %vm547_vm15, %v542_v29, %v910_v24 }
 0x199   : > { %v639_v33 = vpack.c.bf16 %v562_v31, %v548_v32  ;;  %670 = vmatprep.subr.bf16.mxu0 %v640_v30  ;;  %v528_v39 = vpop.permute.xlu1 %527 }
 0x19b   : > { %v919_v36 = vpop.permute.xlu0 %918  ;;  %671 = vmatpush1.bf16.msra.mxu0 %v639_v33 }
 0x19c   : > { %v921_v37 = vunpack.i.h.bf16 %v919_v36  ;;  %v920_v38 = vunpack.i.l.bf16 %v919_v36 }
 0x19e   : > { %v535_v41 = vsel %vm533_vm0, %v920_v38, %v921_v37  ;;  %v534_v42 = vsel %vm533_vm0, %v528_v39, %v920_v38 }
 0x19f   : > { %v638_v43 = vpack.c.bf16 %v535_v41, %v348_v4  ;;  %v637_v44 = vpack.c.bf16 %v534_v42, %v347_v40 }
 0x1a1   : > { %672 = vmatprep.subr.bf16.mxu0 %v638_v43 }
 0x1a2   : > { %673 = vmatpush1.bf16.msra.mxu0 %v637_v44 }
 0x1a5   : > { %849 = vmatmul.mubr.msk.bf16.vlgmr.msra.gmra.mxu0 %vm647_vm1, %v636_v6 }
 0x265   : > { %v692_v11 = vpop.f32.mrf.mxu0 }
 0x266   : > { %v712_v46 = vmul.f32 %v692_v11, %v692_v11 }
 0x267   : > { %v694_v50 = vpop.f32.mrf.mxu0 }
 0x268   : > { %v855_v54 = vpack.c.bf16 %v694_v50, %v692_v11  ;;  %v708_v45 = vadd.f32 %v694_v50, %v692_v11  ;;  %v713_v47 = vmul.f32 %v694_v50, %v694_v50 }
 0x269   : > { %v696_v48 = vpop.f32.mrf.mxu0 }
 0x26a   : > { %707 = vst [vmem:[%s291_s17] sm:$0xff] %v855_v54  ;;  %709 = vadd.xlane.f32.xlu0 %v708_v45  ;;  %v714_v49 = vadd.f32 %v713_v47, %v712_v46 }
 0x26b   : > { %v697_v51 = vpop.f32.mrf.mxu0 }
 0x26c   : > { %715 = vadd.xlane.f32.xlu1 %v714_v49 }
 0x2f3   : > { %v710_v52 = vpop.xlane.xlu0 %709 }
 0x2f4   : > { %711 = vst.msk [vmem:[%s295_s20] sm:$0xff] %vm363_vm7, %v710_v52 }
 0x2f5   : > { %v716_v53 = vpop.xlane.xlu1 %715 }
 0x2f6   : > { %717 = vst.msk [vmem:[%s299_s26] sm:$0xff] %vm363_vm7, %v716_v53 }
 0x2f7 PF: > { %s18_s24 = sadd.s32 1, %s928_s24  }
 0x2f8   : > { %p15_p4 = scmp.ge.s32.totalorder %s18_s24, 4  }
 0x2fa   :  { %17 = sbr.rel (!%p15_p4) target bundleno = 1 (0x1), region = 94 }

</bundles_post_ra>
